<compile_context>
chip_gen: v7x
topology: tpu7x:2x2x1
jax: 0.10.0
libtpu: 0.0.40
codegen_flags: <defaults>
</compile_context>

<pallas_src>
import functools

import jax
import jax.numpy as jnp
from jax import lax
from jax.experimental import pallas as pl
from jax.experimental.pallas import tpu as pltpu

_OUT_LANES = 128   # per-core output row is one lane-dense (8, 128) f32 block


def _make_kernel(*, lane_width, tile_rows, valid_rows, tiles_per_core,
                 need_mask, w_shape, w_dtype):
    """Builds the fused regularization kernel (closes over static config)."""
    n_strips = tile_rows // 8

    def kernel(coeff_ref, w_hbm_ref, p_ref, out_ref, acc_ref):
        core = pl.program_id(0)     # "parallel" axis (v7x: one per TensorCore)
        step = pl.program_id(1)     # "arbitrary" reduction sweep

        @pl.when(step == 0)
        def _init():
            acc_ref[...] = jnp.zeros_like(acc_ref)

        # Global row offset of this tile.  Unclamped on purpose: rows beyond
        # valid_rows (ragged last tile / phantom tiles of an uneven core split)
        # are masked to zero below, so whatever the clamped DMA brought into the
        # buffer is harmless.
        row_base = (core * tiles_per_core + step) * tile_rows

        def _strip(r, carry):
            off = pl.multiple_of(r * 8, 8)
            chunk = p_ref[pl.ds(off, 8), :].astype(jnp.float32)
            if need_mask:
                rid = row_base + off + lax.broadcasted_iota(
                    jnp.int32, (8, lane_width), 0)
                chunk = jnp.where(rid < valid_rows, chunk, 0.0)
            # VPU-only accumulate; no per-step cross-lane (XLU) reduce.
            acc_ref[...] += chunk * chunk
            return carry

        lax.fori_loop(0, n_strips, _strip, 0, unroll=(n_strips <= 16))

        @pl.when(step == pl.num_programs(1) - 1)
        def _finalize():
            # One XLU reduce per core, once per sweep.
            wl2 = jnp.sum(acc_ref[...]) * coeff_ref[1]

            def _with_w(w_vmem, w_sem):
                # One-shot DMA of the small last-layer weight matrix.  W is NOT
                # in the auto-pipelined input path, so no double-buffered copy
                # of it is held resident in VMEM during the streaming sweep.
                cp = pltpu.make_async_copy(w_hbm_ref, w_vmem, w_sem)
                cp.start()
                cp.wait()
                l1 = jnp.sum(jnp.abs(w_vmem[...].astype(jnp.float32)))
                # Only core 0's W term is consumed; zero it elsewhere so the
                # wrapper can simply combine per-core rows.
                wl1 = jnp.where(core == 0, l1 * coeff_ref[0], 0.0)
                lane = lax.broadcasted_iota(jnp.int32, (1, 8, _OUT_LANES), 2)
                out_ref[...] = (jnp.where(lane == 0, wl1, 0.0)
                                + jnp.where(lane == 1, wl2, 0.0)
                                + jnp.where(lane == 2, wl1 + wl2, 0.0))

            pl.run_scoped(_with_w,
                          pltpu.VMEM(w_shape, w_dtype),
                          pltpu.SemaphoreType.DMA(()))

    return kernel


@functools.partial(
    jax.jit,
    static_argnames=("lane_width", "tile_rows", "target_tile_bytes", "num_cores"))
def linear_model_regularization(last_layer_w, prototypes, coefficients, *,
                                lane_width=None, tile_rows=None,
                                target_tile_bytes=2 * 1024 * 1024, num_cores=1):
    """Mirrors LinearModelRegularization.forward for the two concrete components.

    Returns (total_loss, metrics_dict) with each coefficient-weighted loss
    component recorded, as in the PyTorch loop.

    num_cores: 1 for v5e/v6e (1 TensorCore/chip); 2 on v7x to split the
    HBM-bound sweep across both TensorCores (correct on any chip/value).
    """
    # TODO(synk): the PyTorch module iterates an arbitrary list of abstract
    # loss components; two standard ProtoPNet terms are concretized here.
    coefficients = coefficients.astype(jnp.float32)

    # ---- 1. lane-densify the prototype slab ---------------------------------
    flat = prototypes.reshape(-1)
    n = flat.shape[0]
    if lane_width is None:
        lane_width = next((l for l in (2048, 1024, 512, 256, 128)
                           if n % l == 0), 0)
    if lane_width and lane_width % 128:
        raise ValueError("lane_width must be a multiple of 128")
    if not lane_width or n % lane_width:
        # Rare fallback (real ProtoPNet channel counts are multiples of 128):
        # pad the flat slab to a lane multiple; zeros contribute 0 to sum(p^2).
        lane_width = lane_width or 512
        flat = jnp.pad(flat, (0, (-n) % lane_width))
    rows = flat.shape[0] // lane_width
    p2d = flat.reshape(rows, lane_width)
    if rows < 8:
        # Tiny slab: round rows up to one (8, lane) strip (a few KiB at most).
        p2d = jnp.pad(p2d, ((0, 8 - rows), (0, 0)))
        rows = 8

    # ---- 2. size tiles by bytes, not rows -----------------------------------
    itemsize = jnp.dtype(p2d.dtype).itemsize
    if tile_rows is None:
        tile_rows = target_tile_bytes // (lane_width * itemsize)
    tile_rows = max(8, (int(tile_rows) // 8) * 8)
    tile_rows = min(tile_rows, (rows // 8) * 8)

    total_tiles = pl.cdiv(rows, tile_rows)
    num_cores = max(1, int(num_cores))
    tiles_per_core = pl.cdiv(total_tiles, num_cores)
    # Mask whenever the core x tile sweep covers more rows than exist (ragged
    # last tile and/or phantom tiles of an uneven per-core split).
    need_mask = (num_cores * tiles_per_core * tile_rows) != rows
    need_clamp = (num_cores * tiles_per_core) > total_tiles

    def p_index_map(c, i):
        blk = c * tiles_per_core + i
        if need_clamp:
            blk = jnp.minimum(blk, total_tiles - 1)  # phantom tile: re-read, masked
        return (blk, 0)

    p_block = (tile_rows, lane_width)
    p_spec = pl.BlockSpec(p_block, p_index_map)
    if tiles_per_core >= 3:
        try:   # triple-buffer the pure-streaming input when the sweep is long
            p_spec = pl.BlockSpec(p_block, p_index_map,
                                  pipeline_mode=pl.Buffered(3))
        except (AttributeError, TypeError):
            pass  # older jax: keep default double buffering

    kernel = _make_kernel(
        lane_width=lane_width, tile_rows=tile_rows, valid_rows=rows,
        tiles_per_core=tiles_per_core, need_mask=need_mask,
        w_shape=tuple(last_layer_w.shape), w_dtype=last_layer_w.dtype)

    out = pl.pallas_call(
        kernel,
        out_shape=jax.ShapeDtypeStruct((num_cores, 8, _OUT_LANES), jnp.float32),
        grid=(num_cores, tiles_per_core),
        in_specs=[
            pl.BlockSpec(memory_space=pltpu.MemorySpace.SMEM),  # coefficients
            pl.BlockSpec(memory_space=pl.ANY),                  # W stays in HBM
            p_spec,                                             # prototype tiles
        ],
        out_specs=pl.BlockSpec((1, 8, _OUT_LANES), lambda c, i: (c, 0, 0)),
        scratch_shapes=[pltpu.VMEM((8, lane_width), jnp.float32)],
        compiler_params=pltpu.CompilerParams(
            dimension_semantics=("parallel", "arbitrary"),
            # Explicit budget: 2-3 streamed tile buffers (<= ~6 MiB) + the 64 KiB
            # strip accumulator + the one-shot W copy stay far below this,
            # also within v7x's smaller physical VMEM.
            vmem_limit_bytes=32 * 1024 * 1024,
        ),
    )(coefficients, last_layer_w, p2d)

    if num_cores == 1:
        wl1, wl2, total = out[0, 0, 0], out[0, 0, 1], out[0, 0, 2]
    else:
        wl1 = out[0, 0, 0]
        wl2 = jnp.sum(out[:, 0, 1])
        total = wl1 + wl2

    metrics = {"l1_last_layer": wl1, "prototype_l2": wl2}
    return total, metrics


if __name__ == "__main__":
    key = jax.random.PRNGKey(0)
    k_w, k_p, k_p2 = jax.random.split(key, 3)

    # Small ProtoPNet-like "model" parameters (no checkpoint load).
    num_classes, num_prototypes, proto_dim = 4, 20, 96
    last_layer_w = jax.random.normal(
        k_w, (num_classes, num_prototypes), dtype=jnp.float32)
    prototypes = jax.random.normal(
        k_p, (num_prototypes, proto_dim, 1, 1), dtype=jnp.float32)
    coefficients = jnp.array([1e-2, 1e-3], dtype=jnp.float32)  # per-component coeff

    ref_l1 = coefficients[0] * jnp.sum(jnp.abs(last_layer_w))
    ref_l2 = coefficients[1] * jnp.sum(prototypes.astype(jnp.float32) ** 2)
    ref_total = ref_l1 + ref_l2

    # 1) Single-core sweep (v5e/v6e default).  1920 elems -> lane_width 128,
    #    15 rows: exercises the carried accumulator and the ragged-tile mask.
    total, metrics = linear_model_regularization(
        last_layer_w, prototypes, coefficients)
    total = jax.block_until_ready(total)
    assert jnp.allclose(total, ref_total, rtol=1e-5, atol=1e-5), (total, ref_total)
    assert jnp.allclose(metrics["l1_last_layer"], ref_l1, rtol=1e-5, atol=1e-5)
    assert jnp.allclose(metrics["prototype_l2"], ref_l2, rtol=1e-5, atol=1e-5)

    # 2) Two-TensorCore split (v7x): per-core accumulator + per-core output row,
    #    partials summed in the wrapper.  Identical semantics on 1-TC chips.
    total2, metrics2 = linear_model_regularization(
        last_layer_w, prototypes, coefficients, num_cores=2)
    total2 = jax.block_until_ready(total2)
    assert jnp.allclose(total2, ref_total, rtol=1e-5, atol=1e-5), (total2, ref_total)
    assert jnp.allclose(metrics2["prototype_l2"], ref_l2, rtol=1e-5, atol=1e-5)

    # 3) Longer sweep exercising the multi-tile pipeline / triple buffering.
    protos_big = jax.random.normal(k_p2, (256, 128, 1, 1), dtype=jnp.float32)
    ref_total_big = ref_l1 + coefficients[1] * jnp.sum(protos_big ** 2)
    total3, _ = linear_model_regularization(
        last_layer_w, protos_big, coefficients, lane_width=128, tile_rows=8)
    total3 = jax.block_until_ready(total3)
    assert jnp.allclose(total3, ref_total_big, rtol=1e-5, atol=1e-4), (
        total3, ref_total_big)

    print("KERNEL_OK")
</pallas_src>

<mosaic_0001>
module attributes {stable_mosaic.version = 11 : i64} {
  func.func @kernel(%arg0: i32, %arg1: i32, %arg2: memref<2xf32, #tpu.memory_space<smem>>, %arg3: memref<4x20xf32, #tpu.memory_space<any>>, %arg4: memref<8x128xf32, #tpu.memory_space<vmem>>, %arg5: memref<1x8x128xf32, #tpu.memory_space<vmem>>, %arg6: memref<8x128xf32, #tpu.memory_space<vmem>>) attributes {dimension_semantics = [#tpu.dimension_semantics<parallel>, #tpu.dimension_semantics<arbitrary>], iteration_bounds = array<i64: 1, 2>, scalar_prefetch = 0 : i64, scratch_operands = 1 : i64, tpu.core_type = #tpu.core_type<tc>, window_params = [{transform_indices = @transform_0, window_bounds = array<i64: 2>}, {}, {transform_indices = @transform_2, window_bounds = array<i64: 8, 128>}, {transform_indices = @transform_3, window_bounds = array<i64: 1, 8, 128>}]} {
    %c0_i32 = arith.constant 0 : i32
    %0 = arith.cmpi eq, %arg1, %c0_i32 : i32
    %1 = arith.extui %0 : i1 to i32
    %c0_i32_0 = arith.constant 0 : i32
    %2 = arith.cmpi ne, %1, %c0_i32_0 : i32
    scf.if %2 {
      %cst_9 = arith.constant 0.000000e+00 : f32
      %25 = vector.broadcast %cst_9 : f32 to vector<8x128xf32>
      %c0_10 = arith.constant 0 : index
      %c0_11 = arith.constant 0 : index
      %26 = vector.load %arg6[%c0_10, %c0_11] : memref<8x128xf32, #tpu.memory_space<vmem>>, vector<8x128xf32>
      tpu.vector_store %arg6[%c0_10, %c0_11], %25 {strides = array<i32>} : memref<8x128xf32, #tpu.memory_space<vmem>>, vector<8x128xf32>,
    } else {
    }
    %c2_i32 = arith.constant 2 : i32
    %3 = arith.muli %arg0, %c2_i32 : i32
    %4 = arith.addi %3, %arg1 : i32
    %c8_i32 = arith.constant 8 : i32
    %5 = arith.muli %4, %c8_i32 : i32
    %c0_i32_1 = arith.constant 0 : i32
    %c8_i32_2 = arith.constant 8 : i32
    %6 = arith.muli %c0_i32_1, %c8_i32_2 : i32
    %7 = tpu.assume_multiple %6, 8 : i32
    %8 = arith.index_cast %7 : i32 to index
    %c0 = arith.constant 0 : index
    %9 = vector.load %arg4[%8, %c0] : memref<8x128xf32, #tpu.memory_space<vmem>>, vector<8x128xf32>
    %10 = arith.addi %5, %7 : i32
    %11 = tpu.iota {dimensions = array<i32: 0>} : vector<8x128xi32>
    %12 = vector.broadcast %10 : i32 to vector<8x128xi32>
    %13 = arith.addi %12, %11 : vector<8x128xi32>
    %c15_i32 = arith.constant 15 : i32
    %14 = vector.broadcast %c15_i32 : i32 to vector<8x128xi32>
    %15 = arith.cmpi slt, %13, %14 : vector<8x128xi32>
    %cst = arith.constant 0.000000e+00 : f32
    %16 = vector.broadcast %cst : f32 to vector<8x128xf32>
    %17 = arith.select %15, %9, %16 : vector<8x128xi1>, vector<8x128xf32>
    %c0_3 = arith.constant 0 : index
    %c0_4 = arith.constant 0 : index
    %18 = vector.load %arg6[%c0_3, %c0_4] : memref<8x128xf32, #tpu.memory_space<vmem>>, vector<8x128xf32>
    %19 = arith.mulf %17, %17 : vector<8x128xf32>
    %20 = arith.addf %18, %19 : vector<8x128xf32>
    %c0_5 = arith.constant 0 : index
    %c0_6 = arith.constant 0 : index
    %21 = vector.load %arg6[%c0_5, %c0_6] : memref<8x128xf32, #tpu.memory_space<vmem>>, vector<8x128xf32>
    tpu.vector_store %arg6[%c0_5, %c0_6], %20 {strides = array<i32>} : memref<8x128xf32, #tpu.memory_space<vmem>>, vector<8x128xf32>,
    %c1_i32 = arith.constant 1 : i32
    %c1_i32_7 = arith.constant 1 : i32
    %22 = arith.cmpi eq, %arg1, %c1_i32_7 : i32
    %23 = arith.extui %22 : i1 to i32
    %c0_i32_8 = arith.constant 0 : i32
    %24 = arith.cmpi ne, %23, %c0_i32_8 : i32
    scf.if %24 {
      %c0_9 = arith.constant 0 : index
      %c0_10 = arith.constant 0 : index
      %25 = vector.load %arg6[%c0_9, %c0_10] : memref<8x128xf32, #tpu.memory_space<vmem>>, vector<8x128xf32>
      %26 = vector.shape_cast %25 : vector<8x128xf32> to vector<1x8x128xf32>
      %cst_11 = arith.constant dense<0.000000e+00> : vector<1xf32>
      %27 = vector.multi_reduction <add>, %26, %cst_11 [1, 2] : vector<1x8x128xf32> to vector<1xf32>
      %28 = vector.shape_cast %27 : vector<1xf32> to vector<1x1x1xf32>
      %29 = vector.extract %28[0, 0, 0] : f32 from vector<1x1x1xf32>
      %c1 = arith.constant 1 : index
      %30 = memref.load %arg2[%c1] : memref<2xf32, #tpu.memory_space<smem>>
      %31 = arith.mulf %29, %30 : f32
      "tpu.region"() ({
        %alloca = memref.alloca() : memref<4x20xf32, #tpu.memory_space<vmem>>
        %32 = tpu.sem_alloc : memref<!tpu.dma_semaphore, #tpu.memory_space<semaphore_mem>>
        tpu.enqueue_dma source(%arg3 : memref<4x20xf32, #tpu.memory_space<any>>) target(%alloca : memref<4x20xf32, #tpu.memory_space<vmem>>) target_semaphore(%32 : memref<!tpu.dma_semaphore, #tpu.memory_space<semaphore_mem>>)
        tpu.wait_dma2 semaphore(%32 : memref<!tpu.dma_semaphore, #tpu.memory_space<semaphore_mem>>) src(%arg3 : memref<4x20xf32, #tpu.memory_space<any>>) dst(%alloca : memref<4x20xf32, #tpu.memory_space<vmem>>)
        %c0_12 = arith.constant 0 : index
        %c0_13 = arith.constant 0 : index
        %33 = vector.load %alloca[%c0_12, %c0_13] : memref<4x20xf32, #tpu.memory_space<vmem>>, vector<4x20xf32>
        %34 = math.absf %33 : vector<4x20xf32>
        %35 = vector.shape_cast %34 : vector<4x20xf32> to vector<1x4x20xf32>
        %cst_14 = arith.constant dense<0.000000e+00> : vector<1xf32>
        %36 = vector.multi_reduction <add>, %35, %cst_14 [1, 2] : vector<1x4x20xf32> to vector<1xf32>
        %37 = vector.shape_cast %36 : vector<1xf32> to vector<1x1x1xf32>
        %38 = vector.extract %37[0, 0, 0] : f32 from vector<1x1x1xf32>
        %c0_i32_15 = arith.constant 0 : i32
        %39 = arith.cmpi eq, %arg0, %c0_i32_15 : i32
        %c0_16 = arith.constant 0 : index
        %40 = memref.load %arg2[%c0_16] : memref<2xf32, #tpu.memory_space<smem>>
        %41 = arith.mulf %38, %40 : f32
        %cst_17 = arith.constant 0.000000e+00 : f32
        %42 = arith.select %39, %41, %cst_17 : f32
        %43 = tpu.iota {dimensions = array<i32: 2>} : vector<1x8x128xi32>
        %c0_i32_18 = arith.constant 0 : i32
        %44 = vector.broadcast %c0_i32_18 : i32 to vector<1x8x128xi32>
        %45 = arith.cmpi eq, %43, %44 : vector<1x8x128xi32>
        %cst_19 = arith.constant 0.000000e+00 : f32
        %46 = vector.broadcast %42 : f32 to vector<1x8x128xf32>
        %47 = vector.broadcast %cst_19 : f32 to vector<1x8x128xf32>
        %48 = arith.select %45, %46, %47 : vector<1x8x128xi1>, vector<1x8x128xf32>
        %c1_i32_20 = arith.constant 1 : i32
        %49 = vector.broadcast %c1_i32_20 : i32 to vector<1x8x128xi32>
        %50 = arith.cmpi eq, %43, %49 : vector<1x8x128xi32>
        %cst_21 = arith.constant 0.000000e+00 : f32
        %51 = vector.broadcast %31 : f32 to vector<1x8x128xf32>
        %52 = vector.broadcast %cst_21 : f32 to vector<1x8x128xf32>
        %53 = arith.select %50, %51, %52 : vector<1x8x128xi1>, vector<1x8x128xf32>
        %54 = arith.addf %48, %53 : vector<1x8x128xf32>
        %c2_i32_22 = arith.constant 2 : i32
        %55 = vector.broadcast %c2_i32_22 : i32 to vector<1x8x128xi32>
        %56 = arith.cmpi eq, %43, %55 : vector<1x8x128xi32>
        %57 = arith.addf %42, %31 : f32
        %cst_23 = arith.constant 0.000000e+00 : f32
        %58 = vector.broadcast %57 : f32 to vector<1x8x128xf32>
        %59 = vector.broadcast %cst_23 : f32 to vector<1x8x128xf32>
        %60 = arith.select %56, %58, %59 : vector<1x8x128xi1>, vector<1x8x128xf32>
        %61 = arith.addf %54, %60 : vector<1x8x128xf32>
        %c0_24 = arith.constant 0 : index
        %c0_25 = arith.constant 0 : index
        %c0_26 = arith.constant 0 : index
        %62 = vector.load %arg5[%c0_24, %c0_25, %c0_26] : memref<1x8x128xf32, #tpu.memory_space<vmem>>, vector<1x8x128xf32>
        tpu.vector_store %arg5[%c0_24, %c0_25, %c0_26], %61 {strides = array<i32>} : memref<1x8x128xf32, #tpu.memory_space<vmem>>, vector<1x8x128xf32>,
        tpu.yield
      }) : () -> ()
    } else {
    }
    return
  }
  func.func @transform_0(%arg0: i32, %arg1: i32) -> i32 {
    %c0_i32 = arith.constant 0 : i32
    %c0_i32_0 = arith.constant 0 : i32
    return %c0_i32 : i32
  }
  func.func @transform_2(%arg0: i32, %arg1: i32) -> (i32, i32) {
    %c2_i32 = arith.constant 2 : i32
    %0 = arith.muli %arg0, %c2_i32 : i32
    %1 = arith.addi %0, %arg1 : i32
    %c0_i32 = arith.constant 0 : i32
    %c0_i32_0 = arith.constant 0 : i32
    return %1, %c0_i32 : i32, i32
  }
  func.func @transform_3(%arg0: i32, %arg1: i32) -> (i32, i32, i32) {
    %c0_i32 = arith.constant 0 : i32
    %c0_i32_0 = arith.constant 0 : i32
    %c0_i32_1 = arith.constant 0 : i32
    return %arg0, %c0_i32, %c0_i32_0 : i32, i32, i32
  }
}

</mosaic_0001>

<bundles_post_ra>
// kernel: linear_model_regularization.1
= control target key start
LH: loop header
LB: loop body
LE: loop exit
PB: predicated region body
PF: predicated region fallthrough
CT: control target
= control target key end

     0   :  { %8 = vsyncpa [#allocation4], 0  ;;  %s497_s12 = smov 0   ;;  %s499_s13 = smov 0   ;;  %s566_s0 = inlined_call_operand.vmem [shape: f32[2], index: 0, kind: input, shape index: {}]   ;;  %s567_s1 = inlined_call_operand.vmem [shape: f32[4,20], index: 1, kind: input, shape index: {}]   ;;  %s568_s2 = inlined_call_operand.vmem [shape: f32[15,128], index: 2, kind: input, shape index: {}]   ;;  %s569_s3 = inlined_call_operand.vmem [shape: f32[1,8,128], index: 3, kind: output, shape index: {}]  }
   0x1   :  { %s501_s14 = smov 0  }
   0x2 LB: > { %s376_s15 = sadd.s32 4294967295, %s473_s14   ;;  %s23_s16 = sadd.s32 1, %s469_s13  ;;  %s473_s14 = sphi %s501_s14, %s14_s14   ;;  %s469_s13 = sphi %s499_s13, %s573_s13   ;;  %s465_s12 = sphi %s497_s12, %s572_s12  }
   0x3   : > { %p24_p0 = scmp.ge.s32.totalorder %s23_s16, 2  ;;  %p377_p1 = scmp.ge.s32.totalorder %s473_s14, 1 }
   0x4   : > { %p108_p2 = scmp.lt.s32.totalorder %s473_s14, 3  ;;  %p522_p4 = scmp.eq.s32.totalorder %s376_s15, 0 }
   0x5   : > { %s575_s16 = smov (%p24_p0, %s23_s16), 0  ;;  %s121_s21 = sshll.u32 %s566_s0, 4  ;;  %s122_s21 = int_to_ptr.vmem [resolvable:$true] %s121_s21 }
   0x6   : > { %p518_p3 = pnand %p377_p1, %p108_p2  ;;  %s430_s22 = scalar_lea.vmem %s122_s21, 16 }
   0x7   : > { %p431_p7 = scmp.ne.s32.totalorder %s122_s21, %s430_s22  ;;  %p438_p11 = scmp.lt.s32.totalorder %s122_s21, %s122_s21 }
   0x8   : > { %p398_p5 = pneg %p518_p3  ;;  %p439_p12 = scmp.lt.s32.totalorder %s430_s22, %s430_s22 }
   0xa   : > { %p399_p6 = pnand %p522_p4, %p398_p5  ;;  %p440_p13 = por %p439_p12, %p438_p11 }
   0xc   : > { %p432_p8 = pneg %p399_p6 }
   0xe   : > { %p433_p9 = pnand %p432_p8, %p431_p7 }
  0x10   : > { %p434_p10 = pneg %p433_p9 }
  0x12   : > { %p441_p0 = pnand %p440_p13, %p434_p10 }
  0x14   : > { %444 = shalt.err (!%p441_p0)
}
  0x15   : > { %s475_s23 = smov [#allocation3]   ;;  %145 = sbr.rel (%p518_p3) target bundleno = 491 (0x1eb), region = 28 }
  0x16   : > { %401 = dma.vmem_to_smem (!%p399_p6), %s122_s21, 16, %s475_s23, [#allocation4]  }
  0x1c   : > { %458 = dma.done.wait (%p522_p4), [#allocation4], 16  }
  0x1d   : > { %460 = vsyncadd (%p522_p4), [#allocation4], 4294967280 }
  0x1e   : > { %151 = sfence }
  0x1f   : > { %p170_p1 = scmp.lt.s32.totalorder %s465_s12, 1  ;;  %p383_p2 = scmp.ne.s32.totalorder %s465_s12, 0 }
  0x20   : > { %v476_v0 = vmov (!%p383_p2), 0.0  }
  0x21   : > { %s171_s24 = scalar_select %p170_p1, %s465_s12, 1 }
  0x22   : > { %183 = sbr.rel (%p383_p2) target bundleno = 41 (0x29), region = 36  ;;  %184 = vst [vmem:[#allocation2] sm:$0xff] (!%p383_p2), %v476_v0 }
  0x23   : > { %s382_s25 = sshll.u32 %s171_s24, 3 }
  0x24   : > { %s173_s28 = scalar_lea.vmem %s568_s2, %s382_s25 }
  0x29 PF: > { %s384_s29 = sshll.u32 %s465_s12, 3  ;;  %v190_v1 = vlaneseq  ;;  %v188_v4 = vld [vmem:[%s173_s28] sm:$0xff]  ;;  %p385_p3 = scmp.ne.s32.totalorder %s465_s12, 1 }
  0x2a   : > { %v192_v2 = vstv %s384_s29  ;;  %v196_v7 = vld [vmem:[#allocation2] sm:$0xff]  ;;  %s386_s30 = sld [smem:[#allocation3 + $0x1]] (!%p385_p3) }
  0x2b   : > { %v191_v3 = vshrl.u32 %v190_v1, 7 }
  0x2d   : > { %v193_v5 = vadd.s32 %v192_v2, %v191_v3 }
  0x2f   : > { %vm194_vm0 = vcmp.lt.s32.totalorder %v193_v5, 15  ;;  %203 = sbr.rel (%p385_p3) target bundleno = 491 (0x1eb), region = 40 }
  0x30   : > { %v195_v6 = vsel %vm194_vm0, %v188_v4, 0.0 }
  0x31   : > { %v197_v8 = vmul.f32 %v195_v6, %v195_v6 }
  0x33   : > { %v198_v9 = vadd.f32 %v197_v8, %v196_v7 }
  0x35   : > { %199 = vst [vmem:[#allocation2] sm:$0xff] %v198_v9 }
  0x3c   : > { %v204_v10 = vld [vmem:[#allocation2] sm:$0xff] }
  0x3d   : > { %205 = vadd.xlane.f32.xlu0 %v204_v10 }
  0xca   : > { %v206_v11 = vpop.xlane.xlu0 %205 }
  0xcb   : > { %v207_v12 = vrot.slane %v206_v11, 4 }
  0xcd   : > { %v208_v13 = vadd.f32 %v207_v12, %v206_v11 }
  0xcf   : > { %v209_v14 = vrot.slane %v208_v13, 2 }
  0xd1   : > { %v210_v15 = vadd.f32 %v209_v14, %v208_v13 }
  0xd3   : > { %v211_v16 = vrot.slane %v210_v15, 1 }
  0xd5   : > { %v212_v17 = vadd.f32 %v211_v16, %v210_v15 }
  0xd7   : > { %390 = vpush %v212_v17 }
 0x108   : > { %s391_s4 = spop %390 }
 0x109   : > { %s547_s5 = smul.f32 %s391_s4, %s386_s30 }
 0x10a   : > { %v233_v18 = vld [vmem:[%s567_s1] sm:$0xf] }
 0x10b   : > { %234 = vst [vmem:[#allocation5] sm:$0xf] %v233_v18 }
 0x10c   : > { %259 = vsyncadd [#allocation6], 64 }
 0x10d   : > { %461 = dma.done.wait [#allocation6], 64 }
 0x10e   : > { %462 = vsyncadd [#allocation6], 4294967232  ;;  %vm265_vm1 = vcmask 158720   ;;  %s277_s8 = sld [smem:[#allocation3]]  ;;  %v281_v29 = vand.u32 127, %v190_v1  ;;  %v286_v30 = vstv %s547_s5 }
 0x110   : > { %vm285_vm2 = vcmp.eq.s32.totalorder %v281_v29, 1  ;;  %vm282_vm3 = vcmp.eq.s32.totalorder %v281_v29, 0  ;;  %vm289_vm4 = vcmp.eq.s32.totalorder %v281_v29, 2 }
 0x111   : > { %v287_v31 = vsel %vm285_vm2, %v286_v30, 0.0 }
 0x112   : > { %v263_v19 = vld [vmem:[#allocation5] sm:$0xf] }
 0x113   : > { %v264_v20 = vand.u32 2147483647, %v263_v19 }
 0x115   : > { %v266_v21 = vsel %vm265_vm1, %v264_v20, 0.0 }
 0x116   : > { %267 = vadd.xlane.f32.xlu0 %v266_v21 }
 0x1a3   : > { %v268_v22 = vpop.xlane.xlu0 %267 }
 0x1a4   : > { %v269_v23 = vrot.slane %v268_v22, 4 }
 0x1a6   : > { %v270_v24 = vadd.f32 %v269_v23, %v268_v22 }
 0x1a8   : > { %v271_v25 = vrot.slane %v270_v24, 2 }
 0x1aa   : > { %v272_v26 = vadd.f32 %v271_v25, %v270_v24 }
 0x1ac   : > { %v273_v27 = vrot.slane %v272_v26, 1 }
 0x1ae   : > { %v274_v28 = vadd.f32 %v273_v27, %v272_v26 }
 0x1b0   : > { %392 = vpush %v274_v28 }
 0x1e1   : > { %s393_s9 = spop %392 }
 0x1e2   : > { %s278_s10 = smul.f32 %s393_s9, %s277_s8 }
 0x1e4   : > { %v283_v32 = vstv %s278_s10  ;;  %s290_s11 = sadd.f32 %s278_s10, %s547_s5 }
 0x1e5   : > { %v284_v33 = vsel %vm282_vm3, %v283_v32, 0.0 }
 0x1e6   : > { %v288_v34 = vadd.f32 %v287_v31, %v284_v33  ;;  %v291_v35 = vstv %s290_s11 }
 0x1e7   : > { %v292_v36 = vsel %vm289_vm4, %v291_v35, 0.0 }
 0x1e8   : > { %v293_v37 = vadd.f32 %v292_v36, %v288_v34 }
 0x1ea   : > { %294 = vst [vmem:[%s569_s3] sm:$0xff] %v293_v37 }
 0x1eb PF: > { %s14_s14 = sadd.s32 1, %s473_s14   ;;  %s572_s12 = smov %s469_s13 }
 0x1ec   : > { %p11_p4 = scmp.ge.s32.totalorder %s14_s14, 4   ;;  %s573_s13 = smov %s575_s16 }
 0x1ee   :  { %13 = sbr.rel (!%p11_p4) target bundleno = 2 (0x2), region = 112 }
 0x1f5   :  { %314 = vsyncpa [#allocation4], 1 }
 0x1f6   :  { %316 = vsyncpa [#allocation4 + $0x1], 1 }

</bundles_post_ra>
